<compile_context>
chip_gen: v7x
topology: tpu7x:2x2x1
jax: 0.10.0
libtpu: 0.0.40
codegen_flags: <defaults>
</compile_context>

<pallas_src>
import functools

import jax
import jax.numpy as jnp
from jax import lax
from jax.experimental import pallas as pl
from jax.experimental.pallas import tpu as pltpu


def _round_up(v, m):
    return (v + m - 1) // m * m


# ---------------------------------------------------------------------------
# Kernel 1 (runs once per weight update, inside dora_prepare):
#   s_j = magnitude_j / (||W0[:,j] + scaling*(B@A)[:,j]||_2 + eps)
# grid = (in_tiles [parallel], out_tiles [arbitrary, reduction axis last])
# ---------------------------------------------------------------------------
def dora_scale_kernel(w0_ref, a_ref, b_ref, mag_ref, s_ref, acc_ref, *,
                      scaling, eps):
    k = pl.program_id(1)

    @pl.when(k == 0)
    def _():
        acc_ref[...] = jnp.zeros_like(acc_ref)

    # rank-r tile of the LoRA delta; all norm math kept in f32.
    lora = jnp.dot(b_ref[...], a_ref[...], preferred_element_type=jnp.float32)
    wp = w0_ref[...] + scaling * lora
    acc_ref[...] += jnp.sum(wp * wp, axis=0, keepdims=True)

    @pl.when(k == pl.num_programs(1) - 1)
    def _():
        norm = jnp.sqrt(acc_ref[...]) + eps
        s_ref[...] = mag_ref[...] / norm


# ---------------------------------------------------------------------------
# Kernel 2 (hot path):  y = x @ Ws.T + U @ B.T + bias
#   where Ws = W0*s and U = x @ (scaling*A*s).T was precomputed (per forward).
# grid = (n_tiles [parallel], out_tiles [parallel], in_tiles [arbitrary last])
# ---------------------------------------------------------------------------
def dora_matmul_kernel(x_ref, w_ref, u_ref, b_ref, bias_ref, o_ref, acc_ref):
    k = pl.program_id(2)

    @pl.when(k == 0)
    def _():
        acc_ref[...] = jnp.zeros_like(acc_ref)

    # x_tile @ W_tile.T without materializing a transpose: contract last dims.
    acc_ref[...] += lax.dot_general(
        x_ref[...], w_ref[...], dimension_numbers=(((1,), (1,)), ((), ())),
        preferred_element_type=jnp.float32)

    @pl.when(k == pl.num_programs(2) - 1)
    def _():
        # Rank-r epilogue: exactly once per (i, j) output tile.
        lora = lax.dot_general(
            u_ref[...], b_ref[...], dimension_numbers=(((1,), (1,)), ((), ())),
            preferred_element_type=jnp.float32)
        o_ref[...] = (acc_ref[...] + lora + bias_ref[...]).astype(o_ref.dtype)


# ---------------------------------------------------------------------------
# Weight-side preparation: run once per weight update and cache the result.
# ---------------------------------------------------------------------------
def dora_prepare(w0, lora_A, lora_B, magnitude, bias, scaling, *,
                 compute_dtype=jnp.bfloat16, tn=512, tk=1024):
    """w0:(out,in)  lora_A:(r,in)  lora_B:(out,r)  magnitude:(1,in) or (in,)
       bias:(out,) / (1,out) / None  ->  dict of padded, pre-scaled operands."""
    out_f, in_f = w0.shape
    r = lora_A.shape[0]
    eps = float(jnp.finfo(jnp.float32).eps)   # torch.finfo(fp32).eps

    # Tile sizes (lane-aligned) clamped to the padded problem size.
    tn = min(max(128, tn - tn % 128), _round_up(out_f, 128))
    tk = min(max(128, tk - tk % 128), _round_up(in_f, 128))
    outp = _round_up(out_f, tn)
    inp = _round_up(in_f, tk)
    rp = _round_up(max(r, 1), 128)            # lane-dense rank for the MXU

    # Pad once (weights only change per update, never per forward); the scale
    # kernel runs in f32 for accuracy regardless of compute_dtype.
    w0p = jnp.zeros((outp, inp), jnp.float32).at[:out_f, :in_f].set(
        w0.astype(jnp.float32))
    ap = jnp.zeros((rp, inp), jnp.float32).at[:r, :in_f].set(
        lora_A.astype(jnp.float32))
    bp = jnp.zeros((outp, rp), jnp.float32).at[:out_f, :r].set(
        lora_B.astype(jnp.float32))
    magp = jnp.zeros((1, inp), jnp.float32).at[:, :in_f].set(
        magnitude.reshape(1, -1).astype(jnp.float32))
    biasp = jnp.zeros((1, outp), jnp.float32)
    if bias is not None:
        biasp = biasp.at[:, :out_f].set(bias.reshape(1, -1).astype(jnp.float32))

    # Small tn in the prologue keeps vreg/VMEM pressure low around the
    # cross-sublane reduction; the (1, tk) output stays lane-dense.
    tn_s = min(128, outp)
    scale = pl.pallas_call(
        functools.partial(dora_scale_kernel, scaling=float(scaling), eps=eps),
        out_shape=jax.ShapeDtypeStruct((1, inp), jnp.float32),
        grid_spec=pltpu.PrefetchScalarGridSpec(
            num_scalar_prefetch=0,
            grid=(inp // tk, outp // tn_s),
            in_specs=[
                pl.BlockSpec((tn_s, tk), lambda i, k: (k, i)),   # W0
                pl.BlockSpec((rp, tk), lambda i, k: (0, i)),     # A
                pl.BlockSpec((tn_s, rp), lambda i, k: (k, 0)),   # B
                pl.BlockSpec((1, tk), lambda i, k: (0, i)),      # magnitude
            ],
            out_specs=pl.BlockSpec((1, tk), lambda i, k: (0, i)),
            scratch_shapes=[pltpu.VMEM((1, tk), jnp.float32)],
        ),
        compiler_params=pltpu.CompilerParams(
            dimension_semantics=("parallel", "arbitrary"),
            vmem_limit_bytes=48 * 1024 * 1024),
    )(w0p, ap, bp, magp)

    # Fold the per-column DoRA scale (and `scaling` for the LoRA branch) into
    # the weights once; cast MXU operands to compute_dtype (bf16 by default).
    # NOTE: bf16 operands halve HBM traffic and hit the native MXU rate; the
    # f32 accumulators in the kernels keep the reduction error small.
    w_scaled = (w0p * scale).astype(compute_dtype)
    a_scaled = (float(scaling) * ap * scale).astype(compute_dtype)
    b_c = bp.astype(compute_dtype)

    return dict(w=w_scaled, a=a_scaled, b=b_c, bias=biasp,
                tn=tn, tk=tk, rp=rp, out_f=out_f, in_f=in_f,
                outp=outp, inp=inp, compute_dtype=compute_dtype)


# ---------------------------------------------------------------------------
# Hot forward:  y = x @ (W0*s).T + (x @ (scaling*A*s).T) @ B.T + bias
# ---------------------------------------------------------------------------
def dora_apply(x, prep, *, tm=512):
    n, in_f = x.shape
    assert in_f == prep["in_f"], "in_features mismatch"
    cdt = prep["compute_dtype"]
    inp, outp = prep["inp"], prep["outp"]
    tn, tk, rp = prep["tn"], prep["tk"], prep["rp"]

    # One i-tile for small batches so W0 is streamed from HBM exactly once.
    tm = _round_up(min(tm, _round_up(n, 8)), 8)
    np_ = _round_up(n, tm)

    xc = x.astype(cdt)
    if (n, in_f) != (np_, inp):            # skip the pad copy when aligned
        xp = jnp.zeros((np_, inp), cdt).at[:n, :in_f].set(xc)
    else:
        xp = xc

    # Rank-r projection, independent of the output-tile axis: compute ONCE per
    # forward (tiny (N, r) matmul) and pass it in; XLA handles it fine.
    u = jnp.dot(xp, prep["a"].T,
                preferred_element_type=jnp.float32).astype(cdt)

    isz = jnp.dtype(cdt).itemsize
    cost = pl.CostEstimate(
        flops=int(2 * np_ * outp * inp + 2 * np_ * rp * outp),
        transcendentals=0,
        bytes_accessed=int((outp * inp + np_ * inp + np_ * rp + outp * rp) * isz
                           + np_ * outp * x.dtype.itemsize))

    y = pl.pallas_call(
        dora_matmul_kernel,
        out_shape=jax.ShapeDtypeStruct((np_, outp), x.dtype),
        grid_spec=pltpu.PrefetchScalarGridSpec(
            num_scalar_prefetch=0,
            grid=(np_ // tm, outp // tn, inp // tk),
            in_specs=[
                pl.BlockSpec((tm, tk), lambda i, j, k: (i, k)),   # x
                pl.BlockSpec((tn, tk), lambda i, j, k: (j, k)),   # W0*s
                pl.BlockSpec((tm, rp), lambda i, j, k: (i, 0)),   # U
                pl.BlockSpec((tn, rp), lambda i, j, k: (j, 0)),   # B
                pl.BlockSpec((1, tn), lambda i, j, k: (0, j)),    # bias
            ],
            out_specs=pl.BlockSpec((tm, tn), lambda i, j, k: (i, j)),
            scratch_shapes=[pltpu.VMEM((tm, tn), jnp.float32)],
        ),
        compiler_params=pltpu.CompilerParams(
            dimension_semantics=("parallel", "parallel", "arbitrary"),
            vmem_limit_bytes=48 * 1024 * 1024),
        cost_estimate=cost,
    )(xp, prep["w"], u, prep["b"], prep["bias"])

    if (np_, outp) != (n, prep["out_f"]):
        y = y[:n, :prep["out_f"]]
    return y


def dora_linear(x, lora_A, lora_B, w0, magnitude, bias, scaling, **kw):
    """Convenience one-shot API (prepare + apply)."""
    prep = dora_prepare(w0, lora_A, lora_B, magnitude, bias, scaling, **kw)
    return dora_apply(x, prep)


if __name__ == "__main__":
    key = jax.random.PRNGKey(0)
    # Small, deliberately non-tile-aligned shapes (padding paths exercised).
    N, IN, OUT, R = 50, 300, 200, 6
    k1, k2, k3, k4, k5 = jax.random.split(key, 5)

    x = jax.random.normal(k1, (N, IN), jnp.float32)
    w0 = jax.random.normal(k2, (OUT, IN), jnp.float32) * 0.05     # base weight
    lora_A = jax.random.normal(k3, (R, IN), jnp.float32) * 0.10   # lora_A.weight
    lora_B = jax.random.normal(k4, (OUT, R), jnp.float32) * 0.10  # lora_B.weight
    bias = jax.random.normal(k5, (OUT,), jnp.float32) * 0.10      # base bias
    scaling = 2.0

    # DoRA magnitude as initialized by update_layer(): per-input-feature
    # column norms of the original weight, shape (1, in_features).
    magnitude = jnp.linalg.norm(w0, axis=0, keepdims=True)

    # Pure-JAX reference mirroring the PyTorch forward.
    wp = w0 + scaling * (lora_B @ lora_A)
    norm = jnp.linalg.norm(wp, axis=0, keepdims=True) + jnp.finfo(jnp.float32).eps
    y_ref = x @ (magnitude * (wp / norm)).T + bias[None, :]

    # 1) f32 compute path, small tiles -> exercises multi-tile grid, tight tol.
    prep32 = dora_prepare(w0, lora_A, lora_B, magnitude, bias, scaling,
                          compute_dtype=jnp.float32, tn=128, tk=128)
    y32 = dora_apply(x, prep32)
    jax.block_until_ready(y32)
    assert jnp.allclose(y32, y_ref, atol=2e-4, rtol=2e-4), "f32 mismatch"

    # 2) bf16 compute path (default, halves HBM traffic / native MXU rate);
    #    prepared weights cached once, hot forward reuses them.
    prep16 = dora_prepare(w0, lora_A, lora_B, magnitude, bias, scaling,
                          compute_dtype=jnp.bfloat16)
    y16 = dora_apply(x, prep16)
    jax.block_until_ready(y16)
    assert jnp.allclose(y16, y_ref, atol=5e-2, rtol=5e-2), "bf16 mismatch"

    print("KERNEL_OK")
</pallas_src>

<mosaic_0001>
module attributes {stable_mosaic.version = 11 : i64} {
  func.func @dora_scale_kernel(%arg0: i32, %arg1: i32, %arg2: memref<128x128xf32, #tpu.memory_space<vmem>>, %arg3: memref<128x128xf32, #tpu.memory_space<vmem>>, %arg4: memref<128x128xf32, #tpu.memory_space<vmem>>, %arg5: memref<1x128xf32, #tpu.memory_space<vmem>>, %arg6: memref<1x128xf32, #tpu.memory_space<vmem>>, %arg7: memref<1x128xf32, #tpu.memory_space<vmem>>) attributes {dimension_semantics = [#tpu.dimension_semantics<parallel>, #tpu.dimension_semantics<arbitrary>], iteration_bounds = array<i64: 3, 2>, scalar_prefetch = 0 : i64, scratch_operands = 1 : i64, tpu.core_type = #tpu.core_type<tc>, window_params = [{transform_indices = @transform_0, window_bounds = array<i64: 128, 128>}, {transform_indices = @transform_1, window_bounds = array<i64: 128, 128>}, {transform_indices = @transform_2, window_bounds = array<i64: 128, 128>}, {transform_indices = @transform_3, window_bounds = array<i64: 1, 128>}, {transform_indices = @transform_4, window_bounds = array<i64: 1, 128>}]} {
    %c0_i32 = arith.constant 0 : i32
    %0 = arith.cmpi eq, %arg1, %c0_i32 : i32
    %1 = arith.extui %0 : i1 to i32
    %c0_i32_0 = arith.constant 0 : i32
    %2 = arith.cmpi ne, %1, %c0_i32_0 : i32
    scf.if %2 {
      %cst_13 = arith.constant 0.000000e+00 : f32
      %19 = vector.broadcast %cst_13 : f32 to vector<1x128xf32>
      %c0_14 = arith.constant 0 : index
      %c0_15 = arith.constant 0 : index
      %20 = vector.load %arg7[%c0_14, %c0_15] : memref<1x128xf32, #tpu.memory_space<vmem>>, vector<1x128xf32>
      tpu.vector_store %arg7[%c0_14, %c0_15], %19 {strides = array<i32>} : memref<1x128xf32, #tpu.memory_space<vmem>>, vector<1x128xf32>,
    } else {
    }
    %c0 = arith.constant 0 : index
    %c0_1 = arith.constant 0 : index
    %3 = vector.load %arg4[%c0, %c0_1] : memref<128x128xf32, #tpu.memory_space<vmem>>, vector<128x128xf32>
    %c0_2 = arith.constant 0 : index
    %c0_3 = arith.constant 0 : index
    %4 = vector.load %arg3[%c0_2, %c0_3] : memref<128x128xf32, #tpu.memory_space<vmem>>, vector<128x128xf32>
    %cst = arith.constant dense<0.000000e+00> : vector<128x128xf32>
    %5 = tpu.matmul %3, %4, %cst {dimension_numbers = #tpu.dot_dimension_numbers<[1], [0], [0], [1], [0, 0, 1, 1], [], []>} : vector<128x128xf32>, vector<128x128xf32>, vector<128x128xf32> -> vector<128x128xf32>
    %c0_4 = arith.constant 0 : index
    %c0_5 = arith.constant 0 : index
    %6 = vector.load %arg2[%c0_4, %c0_5] : memref<128x128xf32, #tpu.memory_space<vmem>>, vector<128x128xf32>
    %cst_6 = arith.constant 2.000000e+00 : f32
    %7 = vector.broadcast %cst_6 : f32 to vector<128x128xf32>
    %8 = arith.mulf %7, %5 : vector<128x128xf32>
    %9 = arith.addf %6, %8 : vector<128x128xf32>
    %c0_7 = arith.constant 0 : index
    %c0_8 = arith.constant 0 : index
    %10 = vector.load %arg7[%c0_7, %c0_8] : memref<1x128xf32, #tpu.memory_space<vmem>>, vector<1x128xf32>
    %11 = arith.mulf %9, %9 : vector<128x128xf32>
    %cst_9 = arith.constant dense<0.000000e+00> : vector<128xf32>
    %12 = vector.multi_reduction <add>, %11, %cst_9 [0] : vector<128x128xf32> to vector<128xf32>
    %13 = vector.shape_cast %12 : vector<128xf32> to vector<1x128xf32>
    %14 = arith.addf %10, %13 : vector<1x128xf32>
    %c0_10 = arith.constant 0 : index
    %c0_11 = arith.constant 0 : index
    %15 = vector.load %arg7[%c0_10, %c0_11] : memref<1x128xf32, #tpu.memory_space<vmem>>, vector<1x128xf32>
    tpu.vector_store %arg7[%c0_10, %c0_11], %14 {strides = array<i32>} : memref<1x128xf32, #tpu.memory_space<vmem>>, vector<1x128xf32>,
    %c1_i32 = arith.constant 1 : i32
    %16 = arith.cmpi eq, %arg1, %c1_i32 : i32
    %17 = arith.extui %16 : i1 to i32
    %c0_i32_12 = arith.constant 0 : i32
    %18 = arith.cmpi ne, %17, %c0_i32_12 : i32
    scf.if %18 {
      %c0_13 = arith.constant 0 : index
      %c0_14 = arith.constant 0 : index
      %19 = vector.load %arg7[%c0_13, %c0_14] : memref<1x128xf32, #tpu.memory_space<vmem>>, vector<1x128xf32>
      %20 = math.sqrt %19 : vector<1x128xf32>
      %cst_15 = arith.constant 1.1920929E-7 : f32
      %21 = vector.broadcast %cst_15 : f32 to vector<1x128xf32>
      %22 = arith.addf %20, %21 : vector<1x128xf32>
      %c0_16 = arith.constant 0 : index
      %c0_17 = arith.constant 0 : index
      %23 = vector.load %arg5[%c0_16, %c0_17] : memref<1x128xf32, #tpu.memory_space<vmem>>, vector<1x128xf32>
      %24 = arith.divf %23, %22 : vector<1x128xf32>
      %c0_18 = arith.constant 0 : index
      %c0_19 = arith.constant 0 : index
      %25 = vector.load %arg6[%c0_18, %c0_19] : memref<1x128xf32, #tpu.memory_space<vmem>>, vector<1x128xf32>
      tpu.vector_store %arg6[%c0_18, %c0_19], %24 {strides = array<i32>} : memref<1x128xf32, #tpu.memory_space<vmem>>, vector<1x128xf32>,
    } else {
    }
    return
  }
  func.func @transform_0(%arg0: i32, %arg1: i32) -> (i32, i32) {
    %c0_i32 = arith.constant 0 : i32
    return %arg1, %arg0 : i32, i32
  }
  func.func @transform_1(%arg0: i32, %arg1: i32) -> (i32, i32) {
    %c0_i32 = arith.constant 0 : i32
    %c0_i32_0 = arith.constant 0 : i32
    return %c0_i32, %arg0 : i32, i32
  }
  func.func @transform_2(%arg0: i32, %arg1: i32) -> (i32, i32) {
    %c0_i32 = arith.constant 0 : i32
    %c0_i32_0 = arith.constant 0 : i32
    return %arg1, %c0_i32 : i32, i32
  }
  func.func @transform_3(%arg0: i32, %arg1: i32) -> (i32, i32) {
    %c0_i32 = arith.constant 0 : i32
    %c0_i32_0 = arith.constant 0 : i32
    return %c0_i32, %arg0 : i32, i32
  }
  func.func @transform_4(%arg0: i32, %arg1: i32) -> (i32, i32) {
    %c0_i32 = arith.constant 0 : i32
    %c0_i32_0 = arith.constant 0 : i32
    return %c0_i32, %arg0 : i32, i32
  }
}

</mosaic_0001>

<bundles_post_ra>
// kernel: tpu_custom_call.1
= control target key start
LH: loop header
LB: loop body
LE: loop exit
PB: predicated region body
PF: predicated region fallthrough
CT: control target
= control target key end

     0   :  { %s1817_s0 = inlined_call_operand.hbm [shape: f32[256,384], index: 0, kind: input, shape index: {}]   ;;  %s1818_s1 = inlined_call_operand.hbm [shape: f32[128,384], index: 1, kind: input, shape index: {}]   ;;  %s1819_s2 = inlined_call_operand.hbm [shape: f32[256,128], index: 2, kind: input, shape index: {}]   ;;  %s1820_s3 = inlined_call_operand.vmem [shape: f32[1,384], index: 3, kind: input, shape index: {}]   ;;  %s1821_s4 = inlined_call_operand.hbm [shape: f32[1,384], index: 4, kind: output, shape index: {}]  }
   0x1   :  { %1848 = sst [smem:[#allocation25_spill]] %s1818_s1 }
   0x2   :  { %1849 = sst [smem:[#allocation26_spill]] %s1820_s3 }
   0x3   :  { %1850 = sst [smem:[#allocation27_spill]] %s1821_s4 }
   0x4   :  { %9 = vsyncpa [#allocation4], 0 }
   0x5   :  { %11 = vsyncpa [#allocation4 + $0x1], 0 }
   0x6   :  { %12 = vsyncpa [#allocation7], 0 }
   0x7   :  { %14 = vsyncpa [#allocation7 + $0x1], 0 }
   0x8   :  { %15 = vsyncpa [#allocation5], 0 }
   0x9   :  { %17 = vsyncpa [#allocation5 + $0x1], 0  ;;  %s1337_s15 = smov 0   ;;  %s1339_s16 = smov 0  }
   0xa   :  { %s1341_s17 = smov 0   ;;  %s1343_s18 = smov 0  }
   0xb   :  { %s1345_s19 = smov 0   ;;  %s1347_s20 = smov 0  }
   0xc   :  { %s1349_s21 = smov 0   ;;  %s1351_s22 = smov 0  }
   0xd   :  { %s1353_s23 = smov 0   ;;  %s1355_s24 = smov 0  }
   0xe   :  { %s1357_s25 = smov 0   ;;  %s1359_s26 = smov 0  }
   0xf   :  { %s1361_s27 = smov 0   ;;  %s1363_s28 = smov 0  }
  0x10 LB: > { %1851 = sst [smem:[#allocation14_spill]] %s1262_s18  ;;  %s1408_s29 = sadd.s32 4294967295, %s1302_s28   ;;  %s1302_s28 = sphi %s1363_s28, %s23_s28   ;;  %s1298_s27 = sphi %s1361_s27, %s1922_s27   ;;  %s1294_s26 = sphi %s1359_s26, %s1921_s26   ;;  %s1290_s25 = sphi %s1357_s25, %s1920_s25   ;;  %s1286_s24 = sphi %s1355_s24, %s1919_s24   ;;  %s1282_s23 = sphi %s1353_s23, %s1918_s23   ;;  %s1278_s22 = sphi %s1351_s22, %s1917_s22   ;;  %s1274_s21 = sphi %s1349_s21, %s1909_s21   ;;  %s1270_s20 = sphi %s1347_s20, %s1916_s20   ;;  %s1266_s19 = sphi %s1345_s19, %s1915_s19   ;;  %s1262_s18 = sphi %s1343_s18, %s1908_s18   ;;  %s1258_s17 = sphi %s1341_s17, %s1914_s17   ;;  %s1254_s16 = sphi %s1339_s16, %s1913_s16   ;;  %s1250_s15 = sphi %s1337_s15, %s1912_s15  }
  0x11   : > { %1852 = sst [smem:[#allocation15_spill]] %s1266_s19  ;;  %s755_s30 = sadd.s32 4294967294, %s1302_s28  }
  0x12   : > { %1853 = sst [smem:[#allocation16_spill]] %s1278_s22  ;;  %p1827_p0 = scmp.eq.s32.totalorder %s1302_s28, 0 }
  0x13   : > { %1854 = sst [smem:[#allocation17_spill]] %s1286_s24  ;;  %p1826_p1 = scmp.eq.s32.totalorder %s1408_s29, 0 }
  0x14   : > { %1855 = sst [smem:[#allocation18_spill]] %s1290_s25  ;;  %p77_p2 = scmp.ne.s32.totalorder %s1270_s20, %s1266_s19 }
  0x15   : > { %p83_p3 = scmp.ne.s32.totalorder %s1266_s19, %s1262_s18  ;;  %p159_p4 = scmp.eq.s32.totalorder %s1408_s29, 5 }
  0x16   : > { %p165_p5 = scmp.eq.s32.totalorder %s755_s30, 5  ;;  %p79_p6 = por %p77_p2, %p1827_p0 }
  0x17   : > { %p1424_p7 = por %p83_p3, %p1826_p1  ;;  %p1428_p8 = por %p159_p4, %p77_p2 }
  0x18   : > { %p1432_p9 = por %p165_p5, %p83_p3  ;;  %p1825_p10 = scmp.lt.s32.totalorder %s1302_s28, 6 }
  0x19   : > { %s1856_s7 = scalar_select %p1424_p7, 1, 0 }
  0x1a   : > { %s1858_s8 = scalar_select %p1428_p8, 1, 0 }
  0x1b   : > { %1857 = sst [smem:[#allocation19_spill]] %s1856_s7  ;;  %s208_s10 = sand.u32 1, %s1302_s28  }
  0x1c   : > { %1859 = sst [smem:[#allocation20_spill]] %s1858_s8  ;;  %s210_s11 = sand.u32 1, %s1270_s20  }
  0x1d   : > { %s1860_s9 = scalar_select %p1432_p9, 1, 0 }
  0x1e   : > { %s762_s12 = sshll.u32 %s210_s11, 7  ;;  %s763_s13 = sshll.u32 %s1298_s27, 7 }
  0x1f   : > { %1861 = sst [smem:[#allocation21_spill]] %s1860_s9  ;;  %s1862_s1 = sld [smem:[#allocation25_spill]] }
  0x20   : > { %s212_s5 = scalar_lea.vmem [#allocation6], %s762_s12  ;;  %p1447_p11 = pnand %p1825_p10, %p79_p6 }
  0x21   : > { %s218_s18 = sshll.u32 %s212_s5, 4  ;;  %s1455_s11 = scalar_lea.sflag [#allocation7], %s208_s10  ;;  %s1451_s18 = int_to_ptr.vmem [resolvable:$true] %s218_s18 }
  0x22   : > { %p1060_p3 = pneg %p1447_p11 }
  0x25   : > { %s1443_s6 = scalar_lea.hbm %s1862_s1, %s763_s13  ;;  %s1063_s14 = scalar_lea.hbm %s1862_s1, 6144 }
  0x26   : > { %s1058_s13 = scalar_lea.hbm %s1443_s6, 2048  ;;  %p1064_p6 = scmp.lt.u32.totalorder %s1443_s6, %s1862_s1 }
  0x27   : > { %p1059_p2 = scmp.ne.s32.totalorder %s1443_s6, %s1058_s13  ;;  %p1065_p10 = scmp.lt.u32.totalorder %s1063_s14, %s1058_s13 }
  0x28   : > { %p1067_p0 = scmp.lt.u32.totalorder %s1058_s13, %s1443_s6 }
  0x29   : > { %p1061_p4 = pnand %p1060_p3, %p1059_p2  ;;  %p1066_p1 = por %p1065_p10, %p1064_p6 }
  0x2b   : > { %p1062_p5 = pneg %p1061_p4  ;;  %p1068_p12 = por %p1067_p0, %p1066_p1 }
  0x2d   : > { %p1069_p13 = pnand %p1068_p12, %p1062_p5 }
  0x2f   : > { %1072 = shalt.err (!%p1069_p13)
}
  0x30   : > { %s1073_s10 = scalar_lea.vmem %s1451_s18, 2048  ;;  %s1304_s5 = smov [#allocation6]  }
  0x31   : > { %p1074_p2 = scmp.ne.s32.totalorder %s1451_s18, %s1073_s10  ;;  %s1078_s12 = sshll.u32 %s1304_s5, 4  ;;  %s1079_s12 = int_to_ptr.vmem [resolvable:$false] %s1078_s12 }
  0x32   : > { %s1080_s9 = scalar_lea.vmem %s1079_s12, 4096  ;;  %p1081_p8 = scmp.lt.s32.totalorder %s1451_s18, %s1079_s12 }
  0x33   : > { %p1076_p4 = pnand %p1074_p2, %p1060_p3  ;;  %p1082_p10 = scmp.lt.s32.totalorder %s1080_s9, %s1073_s10 }
  0x35   : > { %p1077_p9 = pneg %p1076_p4  ;;  %p1083_p6 = por %p1082_p10, %p1081_p8 }
  0x37   : > { %p1084_p0 = pnand %p1083_p6, %p1077_p9 }
  0x39   : > { %1087 = shalt.err (!%p1084_p0)
}
  0x3a   : > { %s1829_s13 = smov 384   ;;  %s1830_s14 = smov 128  }
  0x3b   : > { %s1832_s30 = smov 8   ;;  %p1864_p1 = scmp.lt.s32.totalorder %s1302_s28, 7 }
  0x3c   : > { %928 = dma.hbm_to_vmem [thread:$0]  (!%p1447_p11), %s1443_s6, 2048, %s1451_s18, %s1455_s11, %s1829_s13, %s1830_s14, %s1832_s30  }
  0x3d   : > { %p1865_p8 = scmp.ge.s32.totalorder %s1302_s28, 1  ;;  %s32_s5 = sadd.s32 1, %s1294_s26 }
  0x3e   : > { %p33_p12 = scmp.ge.s32.totalorder %s32_s5, 2  ;;  %s44_s12 = sadd.s32 1, %s1282_s23 }
  0x3f   : > { %p1490_p9 = pnand %p1865_p8, %p1864_p1  ;;  %p51_p13 = scmp.ne.s32.totalorder %s1282_s23, %s1278_s22 }
  0x40   : > { %p57_p3 = scmp.ne.s32.totalorder %s1278_s22, %s1274_s21  ;;  %s1924_s5 = smov (%p33_p12, %s32_s5), 0 }
  0x41   : > { %s1866_s10 = scalar_select %p1490_p9, 1, 0 }
  0x42   : > { %1868 = sst [smem:[#allocation23_spill]] %s1924_s5  ;;  %s1869_s4 = sadd.s32 1, %s1298_s27 }
  0x43   : > { %1867 = sst [smem:[#allocation22_spill]] %s1866_s10  ;;  %s1926_s4 = smov (!%p33_p12, %s1869_s4), %s1298_s27 }
  0x44   : > { %s1507_s18 = ssub.s32 %s1294_s26, %s1924_s5  ;;  %p1870_p11 = scmp.eq.s32.totalorder %s1302_s28, 0 }
  0x45   : > { %p37_p2 = scmp.ge.s32.totalorder %s1926_s4, 3  ;;  %p1872_p4 = scmp.eq.s32.totalorder %s1408_s29, 0 }
  0x46   : > { %p1511_p5 = por %p1870_p11, %p51_p13  ;;  %s185_s9 = sand.u32 1, %s1282_s23  }
  0x47   : > { %p1517_p10 = por %p1872_p4, %p57_p3  ;;  %s1928_s4 = smov (%p37_p2, %s1926_s4), 0 }
  0x48   : > { %s758_s13 = sshll.u32 %s185_s9, 7  ;;  %s40_s14 = ssub.s32 %s1298_s27, %s1928_s4 }
  0x49   : > { %s1873_s21 = scalar_select %p1517_p10, 1, 0 }
  0x4a   : > { %s41_s30 = sor.u32 %s40_s14, %s1507_s18  ;;  %p68_p0 = scmp.eq.s32.totalorder %s40_s14, 0 }
  0x4b   : > { %1874 = sst [smem:[#allocation24_spill]] %s1873_s21  ;;  %p42_p1 = scmp.eq.s32.totalorder %s41_s30, 0 }
  0x4c   : > { %s913_s1 = smul.u32 48, %s1294_s26  ;;  %s1875_s5 = sadd.s32 1, %s1270_s20 }
  0x4d   : > { %s1532_s8 = scalar_select %p68_p0, %s1270_s20, %s1875_s5  }
  0x4e   : > { %s1535_s24 = scalar_select %p42_p1, %s1282_s23, %s44_s12  }
  0x4f   : > { %s195_s3 = sadd.s32 %s1298_s27, %s913_s1  ;;  %s189_s25 = scalar_lea.vmem [#allocation3], %s758_s13 }
  0x50   : > { %s198_s7 = sshll.u32 %s189_s25, 4  ;;  %s761_s19 = sshll.u32 %s195_s3, 7  ;;  %s1538_s7 = int_to_ptr.vmem [resolvable:$true] %s198_s7 }
  0x51   : > { %s1543_s10 = scalar_lea.hbm %s1817_s0, %s761_s19  ;;  %p1876_p8 = scmp.lt.s32.totalorder %s1302_s28, 6 }
  0x52   : > { %s1553_s1 = scalar_lea.sflag [#allocation4], %s185_s9  ;;  %s1088_s3 = scalar_lea.hbm %s1543_s10, 2048 }
  0x53   : > { %p1549_p12 = pnand %p1876_p8, %p1511_p5  ;;  %p1089_p13 = scmp.ne.s32.totalorder %s1543_s10, %s1088_s3 }
  0x54   : > { %s1093_s25 = scalar_lea.hbm %s1817_s0, 12288  ;;  %p1094_p5 = scmp.lt.u32.totalorder %s1543_s10, %s1817_s0 }
  0x55   : > { %p1090_p3 = pneg %p1549_p12  ;;  %p1095_p4 = scmp.lt.u32.totalorder %s1093_s25, %s1088_s3 }
  0x56   : > { %p1097_p1 = scmp.lt.u32.totalorder %s1088_s3, %s1543_s10 }
  0x57   : > { %p1091_p11 = pnand %p1090_p3, %p1089_p13  ;;  %p1096_p0 = por %p1095_p4, %p1094_p5 }
  0x59   : > { %p1092_p2 = pneg %p1091_p11  ;;  %p1098_p8 = por %p1097_p1, %p1096_p0 }
  0x5b   : > { %p1099_p6 = pnand %p1098_p8, %p1092_p2 }
  0x5d   : > { %1102 = shalt.err (!%p1099_p6)
}
  0x5e   : > { %s1103_s5 = scalar_lea.vmem %s1538_s7, 2048  ;;  %s1308_s12 = smov [#allocation3]  }
  0x5f   : > { %p1104_p13 = scmp.ne.s32.totalorder %s1538_s7, %s1103_s5  ;;  %s1108_s6 = sshll.u32 %s1308_s12, 4  ;;  %s1109_s6 = int_to_ptr.vmem [resolvable:$false] %s1108_s6 }
  0x60   : > { %s1110_s21 = scalar_lea.vmem %s1109_s6, 4096  ;;  %p1111_p10 = scmp.lt.s32.totalorder %s1538_s7, %s1109_s6 }
  0x61   : > { %p1106_p11 = pnand %p1104_p13, %p1090_p3  ;;  %p1112_p5 = scmp.lt.s32.totalorder %s1110_s21, %s1103_s5 }
  0x63   : > { %p1107_p7 = pneg %p1106_p11  ;;  %p1113_p4 = por %p1112_p5, %p1111_p10 }
  0x65   : > { %p1114_p0 = pnand %p1113_p4, %p1107_p7 }
  0x67   : > { %1117 = shalt.err (!%p1114_p0)
}
  0x68   : > { %s1878_s9 = smov 8   ;;  %s1879_s3 = smov 128  }
  0x69   : > { %s1880_s19 = smov 384   ;;  %s96_s14 = sadd.s32 1, %s1258_s17 }
  0x6a   : > { %925 = dma.hbm_to_vmem [thread:$0]  (!%p1549_p12), %s1543_s10, 2048, %s1538_s7, %s1553_s1, %s1880_s19, %s1879_s3, %s1878_s9  }
  0x6b   : > { %p1881_p7 = scmp.eq.s32.totalorder %s1507_s18, 0  ;;  %p103_p10 = scmp.ne.s32.totalorder %s1258_s17, %s1254_s16 }
  0x6c   : > { %p109_p6 = scmp.ne.s32.totalorder %s1254_s16, %s1250_s15  ;;  %s230_s25 = sand.u32 1, %s1258_s17  }
  0x6d   : > { %s1588_s22 = scalar_select %p1881_p7, %s1258_s17, %s96_s14  }
  0x6e   : > { %s776_s13 = sshll.u32 %s1294_s26, 11  ;;  %p1882_p3 = scmp.eq.s32.totalorder %s1302_s28, 0 }
  0x6f   : > { %p1883_p1 = scmp.eq.s32.totalorder %s1408_s29, 0  ;;  %s764_s5 = sshll.u32 %s230_s25, 7 }
  0x70   : > { %p105_p2 = por %p103_p10, %p1882_p3  ;;  %s1607_s7 = scalar_lea.hbm %s1819_s2, %s776_s13 }
  0x71   : > { %p1600_p8 = por %p109_p6, %p1883_p1  ;;  %p1885_p12 = scmp.lt.s32.totalorder %s1302_s28, 6 }
  0x72   : > { %s232_s10 = scalar_lea.vmem [#allocation8], %s764_s5  ;;  %s1118_s1 = scalar_lea.hbm %s1607_s7, 2048 }
  0x73   : > { %s1884_s30 = scalar_select %p1600_p8, 1, 0 }
  0x74   : > { %p1611_p13 = pnand %p1885_p12, %p105_p2  ;;  %s239_s18 = sshll.u32 %s232_s10, 4  ;;  %s1615_s18 = int_to_ptr.vmem [resolvable:$true] %s239_s18 }
  0x75   : > { %p1119_p11 = scmp.ne.s32.totalorder %s1607_s7, %s1118_s1  ;;  %s1123_s14 = scalar_lea.hbm %s1819_s2, 4096 }
  0x76   : > { %p1120_p5 = pneg %p1611_p13  ;;  %p1124_p7 = scmp.lt.u32.totalorder %s1607_s7, %s1819_s2 }
  0x77   : > { %p1125_p10 = scmp.lt.u32.totalorder %s1123_s14, %s1118_s1  ;;  %p1127_p3 = scmp.lt.u32.totalorder %s1118_s1, %s1607_s7 }
  0x78   : > { %p1121_p4 = pnand %p1120_p5, %p1119_p11 }
  0x79   : > { %p1126_p6 = por %p1125_p10, %p1124_p7 }
  0x7a   : > { %p1122_p0 = pneg %p1121_p4 }
  0x7b   : > { %p1128_p2 = por %p1127_p3, %p1126_p6 }
  0x7d   : > { %p1129_p1 = pnand %p1128_p2, %p1122_p0 }
  0x7f   : > { %1132 = shalt.err (!%p1129_p1)
}
  0x80   : > { %s1133_s5 = scalar_lea.vmem %s1615_s18, 2048  ;;  %s1309_s12 = smov [#allocation8]  }
  0x81   : > { %p1134_p12 = scmp.ne.s32.totalorder %s1615_s18, %s1133_s5  ;;  %s1138_s6 = sshll.u32 %s1309_s12, 4  ;;  %s1139_s6 = int_to_ptr.vmem [resolvable:$false] %s1138_s6 }
  0x82   : > { %s1140_s10 = scalar_lea.vmem %s1139_s6, 4096  ;;  %p1141_p8 = scmp.lt.s32.totalorder %s1615_s18, %s1139_s6 }
  0x83   : > { %p1136_p11 = pnand %p1134_p12, %p1120_p5  ;;  %p1142_p7 = scmp.lt.s32.totalorder %s1140_s10, %s1133_s5 }
  0x85   : > { %p1137_p4 = pneg %p1136_p11  ;;  %p1143_p10 = por %p1142_p7, %p1141_p8 }
  0x87   : > { %p1144_p6 = pnand %p1143_p10, %p1137_p4 }
  0x89   : > { %1147 = shalt.err (!%p1144_p6)
}
  0x8a   : > { %931 = dma.hbm_to_vmem [thread:$0]  (!%p1611_p13), %s1607_s7, 2048, %s1615_s18, %s1455_s11, %s1879_s3, %s1879_s3, %s1878_s9  }
  0x8b   : > { %257 = sbr.rel (%p1490_p9) target bundleno = 546 (0x222), region = 36  ;;  %s1888_s21 = sld [smem:[#allocation16_spill]] (!%p1490_p9) }
  0x8c   : > { %s1889_s19 = sld [smem:[#allocation24_spill]] (!%p1490_p9) }
  0x91   : > { %s259_s14 = sand.u32 (!%p1490_p9), 1, %s1888_s21  }
  0x92   : > { %s768_s25 = sshll.u32 %s259_s14, 7  ;;  %s260_s13 = scalar_lea.sflag [#allocation4], %s259_s14 }
  0x93   : > { %s1649_s5 = scalar_lea.vmem [#allocation3], %s768_s25  ;;  %p1890_p8 = scmp.ne.s32.totalorder %s1889_s19, 0 }
  0x95   : > { %1233 = dma.done.wait (%p1890_p8), %s260_s13, 2048  }
  0x96   : > { %1235 = vsyncadd (%p1890_p8), %s260_s13, 4294965248  ;;  %s1891_s15 = sld [smem:[#allocation15_spill]]  ;;  %s1892_s12 = sld [smem:[#allocation19_spill]] }
  0x97   : > { %s268_s6 = sand.u32 1, %s1408_s29  }
  0x98   : > { %s269_s3 = scalar_lea.sflag [#allocation7], %s268_s6 }
  0x9c   : > { %s1657_s11 = sand.u32 1, %s1891_s15   ;;  %p1893_p9 = scmp.ne.s32.totalorder %s1892_s12, 0 }
  0x9d   : > { %s769_s9 = sshll.u32 %s1657_s11, 7 }
  0x9e   : > { %s1660_s7 = scalar_lea.vmem [#allocation6], %s769_s9 }
  0x9f   : > { %1237 = dma.done.wait (%p1893_p9), %s269_s3, 2048  }
  0xa0   : > { %1239 = vsyncadd (%p1893_p9), %s269_s3, 4294965248  ;;  %s279_s18 = sand.u32 1, %s1254_s16   ;;  %p1894_p13 = scmp.ne.s32.totalorder %s1884_s30, 0 }
  0xa1   : > { %s770_s10 = sshll.u32 %s279_s18, 7 }
  0xa2   : > { %s1667_s1 = scalar_lea.vmem [#allocation8], %s770_s10 }
  0xa3   : > { %1241 = dma.done.wait (%p1894_p13), %s269_s3, 2048  }
  0xa4   : > { %1243 = vsyncadd (%p1894_p13), %s269_s3, 4294965248  ;;  %s1895_s29 = sld [smem:[#allocation18_spill]]  ;;  %s1896_s14 = sld [smem:[#allocation26_spill]] }
  0xa5   : > { %s317_s13 = scalar_lea.vmem [#allocation9], %s1657_s11  ;;  %s1897_s15 = sld [smem:[#allocation17_spill]] }
  0xaa   : > { %p320_p5 = scmp.lt.s32.totalorder %s1895_s29, 2 }
  0xab   : > { %p771_p0 = scmp.ne.s32.totalorder %s1897_s15, 0 }
  0xac   : > { %s1930_s29 = smov (!%p320_p5, %s1895_s29), 2  ;;  %v1310_v0 = vmov (!%p771_p0), 0.0  }
  0xad   : > { %s322_s25 = scalar_lea.vmem %s1896_s14, %s1930_s29  ;;  %326 = sbr.rel (%p771_p0) target bundleno = 180 (0xb4), region = 52  ;;  %327 = vst [vmem:[#allocation2] sm:$0x1] (!%p771_p0), %v1310_v0 }
  0xb4 PF: > { %v344_v1 = vld [vmem:[%s1660_s7] sm:$0xff]  ;;  %v345_v2 = vld [vmem:[%s1660_s7 + $0x8] sm:$0xff]  ;;  %v346_v3 = vld [vmem:[%s1660_s7 + $0x10] sm:$0xff]  ;;  %s1898_s30 = sld [smem:[#allocation17_spill]] }
  0xb5   : > { %v865_v4 = vpack.c.bf16 %v345_v2, %v344_v1  ;;  %v347_v5 = vld [vmem:[%s1660_s7 + $0x18] sm:$0xff]  ;;  %v348_v7 = vld [vmem:[%s1660_s7 + $0x20] sm:$0xff]  ;;  %v349_v8 = vld [vmem:[%s1660_s7 + $0x28] sm:$0xff] }
  0xb6   : > { %v869_v6 = vpack.c.bf16 %v347_v5, %v346_v3  ;;  %v873_v9 = vpack.c.bf16 %v349_v8, %v348_v7  ;;  %v328_v10 = vld [vmem:[%s1667_s1] sm:$0xff]  ;;  %v350_v11 = vld [vmem:[%s1660_s7 + $0x30] sm:$0xff]  ;;  %v351_v12 = vld [vmem:[%s1660_s7 + $0x38] sm:$0xff] }
  0xb7   : > { %866 = vmatprep.subr.bf16.mxu0 %v865_v4  ;;  %897 = vmatprep.subr.bf16.mxu1 %v865_v4  ;;  %v336_v13 = vld [vmem:[%s1667_s1 + $0x40] sm:$0xff]  ;;  %v877_v14 = vpack.c.bf16 %v351_v12, %v350_v11  ;;  %v353_v16 = vld [vmem:[%s1660_s7 + $0x48] sm:$0xff]  ;;  %v354_v18 = vld [vmem:[%s1660_s7 + $0x50] sm:$0xff] }
  0xb8   : > { %868 = vmatpush3.bf16.msra.mxu0 %v865_v4  ;;  %905 = vmatpush3.bf16.msra.mxu1 %v865_v4  ;;  %v352_v15 = vld [vmem:[%s1660_s7 + $0x40] sm:$0xff]  ;;  %v355_v19 = vld [vmem:[%s1660_s7 + $0x58] sm:$0xff]  ;;  %v357_v22 = vld [vmem:[%s1660_s7 + $0x68] sm:$0xff] }
  0xb9   : > { %870 = vmatprep.subr.bf16.mxu0 %v869_v6  ;;  %898 = vmatprep.subr.bf16.mxu1 %v869_v6  ;;  %v881_v17 = vpack.c.bf16 %v353_v16, %v352_v15  ;;  %v885_v20 = vpack.c.bf16 %v355_v19, %v354_v18  ;;  %v356_v21 = vld [vmem:[%s1660_s7 + $0x60] sm:$0xff]  ;;  %v358_v24 = vld [vmem:[%s1660_s7 + $0x70] sm:$0xff]  ;;  %v359_v25 = vld [vmem:[%s1660_s7 + $0x78] sm:$0xff] }
  0xba   : > { %841 = vmatprep.mubr.f32.mxu0 %v328_v10  ;;  %853 = vmatprep.mubr.f32.mxu1 %v336_v13  ;;  %v889_v23 = vpack.c.bf16 %v357_v22, %v356_v21  ;;  %v893_v26 = vpack.c.bf16 %v359_v25, %v358_v24  ;;  %v329_v27 = vld [vmem:[%s1667_s1 + $0x8] sm:$0xff]  ;;  %v330_v29 = vld [vmem:[%s1667_s1 + $0x10] sm:$0xff]  ;;  %v331_v31 = vld [vmem:[%s1667_s1 + $0x18] sm:$0xff]  ;;  %p772_p3 = scmp.ne.s32.totalorder %s1898_s30, 1 }
  0xbb   : > { %v337_v28 = vld [vmem:[%s1667_s1 + $0x48] sm:$0xff]  ;;  %v338_v30 = vld [vmem:[%s1667_s1 + $0x50] sm:$0xff]  ;;  %v339_v32 = vld [vmem:[%s1667_s1 + $0x58] sm:$0xff] }
  0xbc   : > { %872 = vmatpush3.bf16.msra.mxu0 %v869_v6  ;;  %906 = vmatpush3.bf16.msra.mxu1 %v869_v6  ;;  %v332_v33 = vld [vmem:[%s1667_s1 + $0x20] sm:$0xff]  ;;  %v333_v35 = vld [vmem:[%s1667_s1 + $0x28] sm:$0xff]  ;;  %v334_v37 = vld [vmem:[%s1667_s1 + $0x30] sm:$0xff] }
  0xbd   : > { %874 = vmatprep.subr.bf16.mxu0 %v873_v9  ;;  %899 = vmatprep.subr.bf16.mxu1 %v873_v9  ;;  %v340_v34 = vld [vmem:[%s1667_s1 + $0x60] sm:$0xff]  ;;  %v341_v36 = vld [vmem:[%s1667_s1 + $0x68] sm:$0xff]  ;;  %v342_v38 = vld [vmem:[%s1667_s1 + $0x70] sm:$0xff] }
  0xbe   : > { %v335_v39 = vld [vmem:[%s1667_s1 + $0x38] sm:$0xff]  ;;  %v506_v42 = vld [vmem:[%s1649_s5 + $0x8] sm:$0xff]  ;;  %v505_v46 = vld [vmem:[%s1649_s5] sm:$0xff] }
  0xbf   : > { %v343_v40 = vld [vmem:[%s1667_s1 + $0x78] sm:$0xff]  ;;  %v507_v57 = vld [vmem:[%s1649_s5 + $0x10] sm:$0xff]  ;;  %v510_v2 = vld [vmem:[%s1649_s5 + $0x28] sm:$0xff] }
  0xc0   : > { %876 = vmatpush3.bf16.msra.mxu0 %v873_v9  ;;  %907 = vmatpush3.bf16.msra.mxu1 %v873_v9  ;;  %v508_v54 = vld [vmem:[%s1649_s5 + $0x18] sm:$0xff]  ;;  %v509_v5 = vld [vmem:[%s1649_s5 + $0x20] sm:$0xff] }
  0xc1   : > { %878 = vmatprep.subr.bf16.mxu0 %v877_v14  ;;  %900 = vmatprep.subr.bf16.mxu1 %v877_v14  ;;  %v513_v15 = vld [vmem:[%s1649_s5 + $0x40] sm:$0xff] }
  0xc4   : > { %880 = vmatpush3.bf16.msra.mxu0 %v877_v14  ;;  %908 = vmatpush3.bf16.msra.mxu1 %v877_v14 }
  0xc5   : > { %882 = vmatprep.subr.bf16.mxu0 %v881_v17  ;;  %901 = vmatprep.subr.bf16.mxu1 %v881_v17 }
  0xc8   : > { %884 = vmatpush3.bf16.msra.mxu0 %v881_v17  ;;  %909 = vmatpush3.bf16.msra.mxu1 %v881_v17  ;;  %v512_v17 = vld [vmem:[%s1649_s5 + $0x38] sm:$0xff] }
  0xc9   : > { %886 = vmatprep.subr.bf16.mxu0 %v885_v20  ;;  %902 = vmatprep.subr.bf16.mxu1 %v885_v20 }
  0xcc   : > { %888 = vmatpush3.bf16.msra.mxu0 %v885_v20  ;;  %910 = vmatpush3.bf16.msra.mxu1 %v885_v20  ;;  %v511_v20 = vld [vmem:[%s1649_s5 + $0x30] sm:$0xff] }
  0xcd   : > { %890 = vmatprep.subr.bf16.mxu0 %v889_v23  ;;  %903 = vmatprep.subr.bf16.mxu1 %v889_v23 }
  0xd0   : > { %892 = vmatpush3.bf16.msra.mxu0 %v889_v23  ;;  %911 = vmatpush3.bf16.msra.mxu1 %v889_v23 }
  0xd1   : > { %894 = vmatprep.subr.bf16.mxu0 %v893_v26  ;;  %904 = vmatprep.subr.bf16.mxu1 %v893_v26 }
  0xd4   : > { %896 = vmatpush3.bf16.msra.mxu0 %v893_v26  ;;  %912 = vmatpush3.bf16.msra.mxu1 %v893_v26 }
  0xd7   : > { %842 = vmatmul.mubr.f32.vlgmr.msra.gmra.mrb[0].mxu0 %v329_v27  ;;  %854 = vmatmul.mubr.f32.vlgmr.msra.gmra.mrb[0].mxu1 %v337_v28 }
  0xd8   : > { %844 = vmatprep.mubr.f32.mxu0 %v330_v29  ;;  %856 = vmatprep.mubr.f32.mxu1 %v338_v30 }
  0xdb   : > { %845 = vmatmul.mubr.f32.gmra.mrb[2].mxu0 %v331_v31  ;;  %857 = vmatmul.mubr.f32.gmra.mrb[2].mxu1 %v339_v32  ;;  %v514_v32 = vld [vmem:[%s1649_s5 + $0x48] sm:$0xff] }
  0xdc   : > { %847 = vmatprep.mubr.f32.mxu0 %v332_v33  ;;  %859 = vmatprep.mubr.f32.mxu1 %v340_v34  ;;  %v515_v33 = vld [vmem:[%s1649_s5 + $0x50] sm:$0xff] }
  0xdf   : > { %848 = vmatmul.mubr.f32.gmra.mrb[4].mxu0 %v333_v35  ;;  %860 = vmatmul.mubr.f32.gmra.mrb[4].mxu1 %v341_v36 }
  0xe0   : > { %850 = vmatprep.mubr.f32.mxu0 %v334_v37  ;;  %862 = vmatprep.mubr.f32.mxu1 %v342_v38 }
  0xe3   : > { %851 = vmatmul.mubr.f32.gmra.mrb[6].mxu0 %v335_v39  ;;  %863 = vmatmul.mubr.f32.gmra.mrb[6].mxu1 %v343_v40 }
 0x1aa   : > { %v843_v41 = vpop.f32.mrb[0].mxu0  ;;  %v855_v43 = vpop.f32.mrb[0].mxu1 }
 0x1ab   : > { %v522_v44 = vmul.f32 2.0, %v843_v41  ;;  %v426_v45 = vpop.f32.mrb[1].mxu0  ;;  %v466_v47 = vpop.f32.mrb[1].mxu1  ;;  %v530_v25 = vmul.f32 2.0, %v855_v43  ;;  %v516_v41 = vld [vmem:[%s1649_s5 + $0x58] sm:$0xff] }
 0x1ac   : > { %v521_v48 = vmul.f32 2.0, %v426_v45  ;;  %v529_v9 = vmul.f32 2.0, %v466_v47 }
 0x1ad   : > { %v538_v49 = vadd.f32 %v522_v44, %v506_v42  ;;  %v546_v36 = vadd.f32 %v530_v25, %v514_v32  ;;  %v517_v44 = vld [vmem:[%s1649_s5 + $0x60] sm:$0xff] }
 0x1ae   : > { %v537_v50 = vadd.f32 %v521_v48, %v505_v46  ;;  %v846_v51 = vpop.f32.mrb[2].mxu0  ;;  %v858_v52 = vpop.f32.mrb[2].mxu1  ;;  %v545_v26 = vadd.f32 %v529_v9, %v513_v15 }
 0x1af   : > { %v555_v53 = vmul.f32 %v538_v49, %v538_v49  ;;  %v524_v55 = vmul.f32 2.0, %v846_v51  ;;  %v436_v56 = vpop.f32.mrb[3].mxu0  ;;  %v476_v58 = vpop.f32.mrb[3].mxu1  ;;  %v532_v38 = vmul.f32 2.0, %v858_v52  ;;  %v563_v46 = vmul.f32 %v546_v36, %v546_v36  ;;  %v518_v51 = vld [vmem:[%s1649_s5 + $0x68] sm:$0xff] }
 0x1b0   : > { %v554_v59 = vmul.f32 %v537_v50, %v537_v50  ;;  %v523_v60 = vmul.f32 2.0, %v436_v56  ;;  %v531_v27 = vmul.f32 2.0, %v476_v58  ;;  %v562_v37 = vmul.f32 %v545_v26, %v545_v26 }
 0x1b1   : > { %v540_v62 = vadd.f32 %v524_v55, %v508_v54  ;;  %v548_v47 = vadd.f32 %v532_v38, %v516_v41  ;;  %v519_v55 = vld [vmem:[%s1649_s5 + $0x70] sm:$0xff] }
 0x1b2   : > { %v570_v61 = vadd.f32 %v555_v53, %v554_v59  ;;  %v539_v63 = vadd.f32 %v523_v60, %v507_v57  ;;  %v849_v0 = vpop.f32.mrb[4].mxu0  ;;  %v861_v1 = vpop.f32.mrb[4].mxu1  ;;  %v547_v42 = vadd.f32 %v531_v27, %v515_v33 }
 0x1b3   : > { %v526_v3 = vmul.f32 2.0, %v849_v0  ;;  %v446_v4 = vpop.f32.mrb[5].mxu0  ;;  %v486_v6 = vpop.f32.mrb[5].mxu1  ;;  %v557_v10 = vmul.f32 %v540_v62, %v540_v62  ;;  %v534_v48 = vmul.f32 2.0, %v861_v1  ;;  %v565_v52 = vmul.f32 %v548_v47, %v548_v47  ;;  %v520_v62 = vld [vmem:[%s1649_s5 + $0x78] sm:$0xff] }
 0x1b4   : > { %v556_v7 = vmul.f32 %v539_v63, %v539_v63  ;;  %v525_v8 = vmul.f32 2.0, %v446_v4  ;;  %v533_v43 = vmul.f32 2.0, %v486_v6  ;;  %v564_v50 = vmul.f32 %v547_v42, %v547_v42 }
 0x1b5   : > { %v542_v12 = vadd.f32 %v526_v3, %v510_v2  ;;  %v550_v57 = vadd.f32 %v534_v48, %v518_v51 }
 0x1b6   : > { %v571_v11 = vadd.f32 %v570_v61, %v556_v7  ;;  %v541_v13 = vadd.f32 %v525_v8, %v509_v5  ;;  %v852_v14 = vpop.f32.mrb[6].mxu0  ;;  %v864_v16 = vpop.f32.mrb[6].mxu1  ;;  %v549_v53 = vadd.f32 %v533_v43, %v517_v44 }
 0x1b7   : > { %v528_v18 = vmul.f32 2.0, %v852_v14  ;;  %v456_v19 = vpop.f32.mrb[7].mxu0  ;;  %v496_v21 = vpop.f32.mrb[7].mxu1  ;;  %v559_v28 = vmul.f32 %v542_v12, %v542_v12  ;;  %v536_v60 = vmul.f32 2.0, %v864_v16  ;;  %v567_v0 = vmul.f32 %v550_v57, %v550_v57 }
 0x1b8   : > { %v558_v22 = vmul.f32 %v541_v13, %v541_v13  ;;  %v572_v23 = vadd.f32 %v571_v11, %v557_v10  ;;  %v527_v24 = vmul.f32 2.0, %v456_v19  ;;  %v535_v54 = vmul.f32 2.0, %v496_v21  ;;  %v553_v13 = vld [vmem:[#allocation2] sm:$0x1] }
 0x1b9   : > { %v544_v30 = vadd.f32 %v528_v18, %v512_v17  ;;  %v566_v59 = vmul.f32 %v549_v53, %v549_v53  ;;  %v552_v3 = vadd.f32 %v536_v60, %v520_v62 }
 0x1ba   : > { %v573_v29 = vadd.f32 %v572_v23, %v558_v22  ;;  %v543_v31 = vadd.f32 %v527_v24, %v511_v20  ;;  %v551_v61 = vadd.f32 %v535_v54, %v519_v55  ;;  %v606_v23 = vld [vmem:[%s322_s25] sm:$0x1] (!%p772_p3) }
 0x1bb   : > { %v561_v39 = vmul.f32 %v544_v30, %v544_v30  ;;  %v569_v5 = vmul.f32 %v552_v3, %v552_v3 }
 0x1bc   : > { %v560_v34 = vmul.f32 %v543_v31, %v543_v31  ;;  %v574_v35 = vadd.f32 %v573_v29, %v559_v28  ;;  %v568_v4 = vmul.f32 %v551_v61, %v551_v61 }
 0x1be   : > { %v575_v40 = vadd.f32 %v574_v35, %v560_v34 }
 0x1c0   : > { %v576_v45 = vadd.f32 %v575_v40, %v561_v39 }
 0x1c2   : > { %v577_v49 = vadd.f32 %v576_v45, %v562_v37 }
 0x1c4   : > { %v578_v56 = vadd.f32 %v577_v49, %v563_v46 }
 0x1c6   : > { %v579_v58 = vadd.f32 %v578_v56, %v564_v50 }
 0x1c8   : > { %v580_v63 = vadd.f32 %v579_v58, %v565_v52 }
 0x1ca   : > { %v581_v2 = vadd.f32 %v580_v63, %v566_v59 }
 0x1cc   : > { %v582_v1 = vadd.f32 %v581_v2, %v567_v0 }
 0x1ce   : > { %v583_v6 = vadd.f32 %v582_v1, %v568_v4 }
 0x1d0   : > { %v584_v7 = vadd.f32 %v583_v6, %v569_v5 }
 0x1d2   : > { %v585_v8 = vrot.slane %v584_v7, 4 }
 0x1d4   : > { %v586_v9 = vadd.f32 %v585_v8, %v584_v7 }
 0x1d6   : > { %v587_v10 = vrot.slane %v586_v9, 2 }
 0x1d8   : > { %v588_v11 = vadd.f32 %v587_v10, %v586_v9 }
 0x1da   : > { %v589_v12 = vrot.slane %v588_v11, 1  ;;  %596 = sbr.rel (%p772_p3) target bundleno = 519 (0x207), region = 56 }
 0x1dc   : > { %v590_v14 = vadd.f32 %v589_v12, %v588_v11 }
 0x1de   : > { %v591_v15 = vadd.f32 %v590_v14, %v553_v13 }
 0x1e0   : > { %592 = vst [vmem:[#allocation2] sm:$0x1] %v591_v15 }
 0x1e7   : > { %v597_v16 = vld [vmem:[#allocation2] sm:$0x1] }
 0x1e8   : > { %1054 = vrsqrt.f32 %v597_v16  ;;  %vm600_vm0 = vcmp.eq.f32.partialorder %v597_v16, inf  ;;  %v603_v18 = vand.u32 2147483648, %v597_v16  ;;  %vm602_vm1 = vcmp.eq.f32.partialorder %v597_v16, 0.0 }
 0x1f2   : > { %v1055_v17 = vpop.eup %1054 }
 0x1f3   : > { %v599_v19 = vmul.f32 %v1055_v17, %v597_v16 }
 0x1f5   : > { %v601_v20 = vsel %vm600_vm0, %v597_v16, %v599_v19 }
 0x1f6   : > { %v604_v21 = vsel %vm602_vm1, %v603_v18, %v601_v20 }
 0x1f7   : > { %v605_v22 = vadd.f32 1.1920929e-07, %v604_v21 }
 0x1f9   : > { %1056 = vrcp.f32 %v605_v22 }
 0x203   : > { %v1057_v24 = vpop.eup %1056 }
 0x204   : > { %v608_v25 = vmul.f32 %v1057_v24, %v606_v23 }
 0x206   : > { %609 = vst [vmem:[%s317_s13] sm:$0x1] %v608_v25 }
 0x207 PF: > { %s1900_s9 = sld [smem:[#allocation18_spill]]  ;;  %s1901_s3 = sld [smem:[#allocation20_spill]] }
 0x208   : > { %s1902_s1 = sld [smem:[#allocation27_spill]]  ;;  %s623_s19 = sshll.u32 %s317_s13, 4  ;;  %s624_s19 = int_to_ptr.vmem [resolvable:$true] %s623_s19 }
 0x209   : > { %s611_s29 = scalar_lea.sflag [#allocation5], %s1657_s11  ;;  %s1148_s14 = scalar_lea.vmem %s624_s19, 16 }
 0x20a   : > { %p1149_p2 = scmp.ne.s32.totalorder %s624_s19, %s1148_s14  ;;  %s1311_s25 = smov [#allocation9]  }
 0x20b   : > { %s1152_s15 = sshll.u32 %s1311_s25, 4  ;;  %s1153_s15 = int_to_ptr.vmem [resolvable:$false] %s1152_s15 }
 0x20c   : > { %s1154_s30 = scalar_lea.vmem %s1153_s15, 32  ;;  %p1155_p4 = scmp.lt.s32.totalorder %s624_s19, %s1153_s15 }
 0x20d   : > { %s773_s7 = sshll.u32 %s1900_s9, 4  ;;  %p1903_p1 = scmp.ne.s32.totalorder %s1901_s3, 0 }
 0x20e   : > { %s1743_s21 = scalar_lea.hbm %s1902_s1, %s773_s7  ;;  %p1156_p7 = scmp.lt.s32.totalorder %s1154_s30, %s1148_s14 }
 0x20f   : > { %p1150_p12 = pnand %p1149_p2, %p1903_p1 }
 0x210   : > { %p1157_p10 = por %p1156_p7, %p1155_p4 }
 0x211   : > { %p1151_p11 = pneg %p1150_p12 }
 0x213   : > { %p1158_p6 = pnand %p1157_p10, %p1151_p11 }
 0x215   : > { %1161 = shalt.err (!%p1158_p6)
}
 0x216   : > { %s1162_s11 = scalar_lea.hbm %s1743_s21, 16  ;;  %s1166_s12 = scalar_lea.hbm %s1902_s1, 48 }
 0x217   : > { %p1163_p8 = scmp.ne.s32.totalorder %s1743_s21, %s1162_s11  ;;  %p1167_p5 = scmp.lt.u32.totalorder %s1743_s21, %s1902_s1 }
 0x218   : > { %p1168_p0 = scmp.lt.u32.totalorder %s1166_s12, %s1162_s11  ;;  %p1170_p2 = scmp.lt.u32.totalorder %s1162_s11, %s1743_s21 }
 0x219   : > { %p1164_p9 = pnand %p1163_p8, %p1903_p1 }
 0x21a   : > { %p1169_p3 = por %p1168_p0, %p1167_p5 }
 0x21b   : > { %p1165_p13 = pneg %p1164_p9 }
 0x21c   : > { %p1171_p12 = por %p1170_p2, %p1169_p3 }
 0x21e   : > { %p1172_p11 = pnand %p1171_p12, %p1165_p13 }
 0x220   : > { %1175 = shalt.err (!%p1172_p11)
}
 0x221   : > { %920 = dma.vmem_to_hbm [thread:$0]  (%p1903_p1), %s624_s19, 16, %s1743_s21, %s611_s29  }
 0x222 PF: > { %s1904_s7 = sld [smem:[#allocation14_spill]]  ;;  %s1905_s18 = sld [smem:[#allocation21_spill]] }
 0x223   : > { %p937_p4 = scmp.ge.s32.totalorder %s1302_s28, 2 }
 0x228   : > { %s635_s10 = sand.u32 1, %s1904_s7   ;;  %p1906_p7 = scmp.ne.s32.totalorder %s1905_s18, 0 }
 0x229   : > { %s636_s14 = scalar_lea.sflag [#allocation5], %s635_s10 }
 0x22a   : > { %p933_p10 = pnand %p937_p4, %p1906_p7 }
 0x22c   : > { %1245 = dma.done.wait (!%p933_p10), %s636_s14, 16  }
 0x22d   : > { %1247 = vsyncadd (!%p933_p10), %s636_s14, 4294967280  ;;  %s23_s28 = sadd.s32 1, %s1302_s28   ;;  %s1908_s18 = sld [smem:[#allocation15_spill]] }
 0x22e   : > { %p1770_p6 = scmp.ge.s32.totalorder %s23_s28, 8   ;;  %s1909_s21 = sld [smem:[#allocation16_spill]] }
 0x22f   : > { %s1910_s3 = sld [smem:[#allocation23_spill]]  ;;  %s1912_s15 = smov %s1254_s16 }
 0x230   : > { %s1913_s16 = smov %s1258_s17  ;;  %s1914_s17 = smov %s1588_s22 }
 0x231   : > { %s1915_s19 = smov %s1270_s20  ;;  %s1916_s20 = smov %s1532_s8 }
 0x232   : > { %s1917_s22 = smov %s1282_s23  ;;  %s1918_s23 = smov %s1535_s24 }
 0x233   : > { %s1919_s24 = smov %s1294_s26  ;;  %s1920_s25 = smov %s1298_s27 }
 0x234   : > { %s1922_s27 = smov %s1928_s4  ;;  %22 = sbr.rel (!%p1770_p6) target bundleno = 16 (0x10), region = 116 }
 0x235   : > { %s1921_s26 = smov %s1910_s3 }
 0x23b   :  { %640 = vsyncpa [#allocation4], 1 }
 0x23c   :  { %642 = vsyncpa [#allocation4 + $0x1], 1 }
 0x23d   :  { %643 = vsyncpa [#allocation7], 1 }
 0x23e   :  { %645 = vsyncpa [#allocation7 + $0x1], 1 }
 0x23f   :  { %646 = vsyncpa [#allocation5], 1 }
 0x240   :  { %648 = vsyncpa [#allocation5 + $0x1], 1 }

</bundles_post_ra>
